<compile_context>
chip_gen: v7x
topology: tpu7x:2x2x1
jax: 0.10.0
libtpu: 0.0.40
codegen_flags: <defaults>
</compile_context>

<pallas_src>
import jax
import jax.numpy as jnp
from jax.experimental import pallas as pl
from jax.experimental.pallas import tpu as pltpu


def residual_block_kernel(x_ref, wt_ref, b_ref, o_ref):
    x = x_ref[...]                          # (TB, Cp)  native dtype
    wt = wt_ref[...]                        # (Cp, Cp)  = W.T, canonical (K, N)
    b = b_ref[...].astype(jnp.float32)      # (1, Cp)

    # fc #1 + relu (MXU, f32 accumulation)
    h = jnp.dot(x, wt, preferred_element_type=jnp.float32) + b
    h = jnp.maximum(h, 0.0)

    # fc #2 (same shared weights); feed MXU in the input dtype (bf16 fast path)
    y = jnp.dot(h.astype(x.dtype), wt, preferred_element_type=jnp.float32) + b

    # residual add + relu in f32, downcast once on store (lane-dense)
    o_ref[...] = jnp.maximum(x.astype(jnp.float32) + y, 0.0).astype(o_ref.dtype)


def _round_up(n, m):
    return pl.cdiv(n, m) * m


def residual_block(x, weight, bias, *, batch_tile=512):
    """x: (B, C); weight: (C, C) torch nn.Linear layout (out, in); bias: (C,)."""
    B, C = x.shape
    dtype = x.dtype
    itemsize = jnp.dtype(dtype).itemsize
    w_itemsize = jnp.dtype(weight.dtype).itemsize

    # ---- channel padding (only when C is not already lane-dense) ----------
    Cp = _round_up(C, 128)
    wt = weight.T                                     # one-time (K, N) layout
    if Cp != C:
        x_in = jnp.zeros((B, Cp), dtype).at[:, :C].set(x)
        w_in = jnp.zeros((Cp, Cp), weight.dtype).at[:C, :C].set(wt)
        b_in = jnp.zeros((1, Cp), bias.dtype).at[0, :C].set(bias)
    else:
        x_in = x                                      # no extra HBM pass
        w_in = wt
        b_in = bias.reshape(1, Cp)

    # ---- batch tile selection ---------------------------------------------
    TB = min(_round_up(batch_tile, 8), _round_up(B, 8))
    # v7x megacore: ensure >= 2 parallel grid steps when there is enough work.
    if pl.cdiv(B, TB) == 1 and B >= 16:
        TB = _round_up(pl.cdiv(B, 2), 8)

    # ---- VMEM accounting (v7x has only 64 MiB) ------------------------------
    try:
        vmem_cap = int(pltpu.get_tpu_info().vmem_capacity_bytes)
    except Exception:  # conservative: smallest current generation (v7x)
        vmem_cap = 64 * 1024 * 1024

    def _footprint(tb):
        stream = 2 * 2 * tb * Cp * itemsize           # x + out, double-buffered
        resident = 2 * (Cp * Cp * w_itemsize + Cp * 4)  # worst case: dbl-buffered W/b
        temps = 4 * tb * Cp * 4                       # h / y / f32 residual temps
        return stream + resident + temps

    budget = int(0.7 * vmem_cap)
    while _footprint(TB) > budget and TB > 8:
        TB = max(8, _round_up(TB // 2, 8))
    grid_b = pl.cdiv(B, TB)

    vmem_limit = int(min(max(2 * _footprint(TB), 32 * 1024 * 1024),
                         int(0.9 * vmem_cap)))

    cost = pl.CostEstimate(
        flops=4 * B * Cp * Cp,                        # two matmuls
        transcendentals=0,
        bytes_accessed=(2 * B * Cp * itemsize         # x read + out write
                        + Cp * Cp * w_itemsize        # weight (read once)
                        + Cp * jnp.dtype(bias.dtype).itemsize),
    )

    def _build(single_buffer_resident):
        if single_buffer_resident:
            w_spec = pl.BlockSpec((Cp, Cp), lambda i: (0, 0),
                                  pipeline_mode=pl.Buffered(1))
            b_spec = pl.BlockSpec((1, Cp), lambda i: (0, 0),
                                  pipeline_mode=pl.Buffered(1))
        else:
            w_spec = pl.BlockSpec((Cp, Cp), lambda i: (0, 0))
            b_spec = pl.BlockSpec((1, Cp), lambda i: (0, 0))
        return pl.pallas_call(
            residual_block_kernel,
            out_shape=jax.ShapeDtypeStruct((B, Cp), dtype),
            grid=(grid_b,),
            in_specs=[
                pl.BlockSpec((TB, Cp), lambda i: (i, 0)),  # streamed batch tile
                w_spec,                                    # resident weight
                b_spec,                                    # resident bias
            ],
            out_specs=pl.BlockSpec((TB, Cp), lambda i: (i, 0)),
            compiler_params=pltpu.CompilerParams(
                dimension_semantics=("parallel",),         # megacore on v7x
                vmem_limit_bytes=vmem_limit,
            ),
            cost_estimate=cost,
        )

    try:
        out = _build(True)(x_in, w_in, b_in)
    except Exception:
        # Fallback if this Pallas build rejects Buffered(1) for resident
        # operands: default double-buffering only costs extra VMEM.
        out = _build(False)(x_in, w_in, b_in)

    return out[:, :C] if Cp != C else out


def residual_block_ref(x, weight, bias):
    # Pure-JAX reference (mirrors the PyTorch module).
    y = jax.nn.relu(x @ weight.T + bias)
    y = y @ weight.T + bias
    return jax.nn.relu(x + y)


if __name__ == "__main__":
    key = jax.random.PRNGKey(0)
    k_x, k_w, k_b = jax.random.split(key, 3)

    batch, channel = 8, 32

    x = jax.random.normal(k_x, (batch, channel), dtype=jnp.float32)
    # Deterministic "Kaiming-uniform-like" init for the Linear layer.
    bound = 1.0 / (channel ** 0.5)
    weight = jax.random.uniform(k_w, (channel, channel), jnp.float32, -bound, bound)
    bias = jax.random.uniform(k_b, (channel,), jnp.float32, -bound, bound)

    out = jax.block_until_ready(residual_block(x, weight, bias))
    ref = residual_block_ref(x, weight, bias)

    assert out.shape == (batch, channel)
    assert jnp.allclose(out, ref, atol=1e-5, rtol=1e-5)

    print("KERNEL_OK")
</pallas_src>

<mosaic_0001>
module attributes {stable_mosaic.version = 11 : i64} {
  func.func @residual_block_kernel(%arg0: i32, %arg1: memref<8x128xf32, #tpu.memory_space<vmem>>, %arg2: memref<128x128xf32, #tpu.memory_space<vmem>>, %arg3: memref<1x128xf32, #tpu.memory_space<vmem>>, %arg4: memref<8x128xf32, #tpu.memory_space<vmem>>) attributes {dimension_semantics = [#tpu.dimension_semantics<parallel>], iteration_bounds = array<i64: 1>, scalar_prefetch = 0 : i64, scratch_operands = 0 : i64, tpu.core_type = #tpu.core_type<tc>, window_params = [{transform_indices = @transform_0, window_bounds = array<i64: 8, 128>}, {pipeline_mode = #tpu.pipeline_mode<synchronous>, transform_indices = @transform_1, window_bounds = array<i64: 128, 128>}, {pipeline_mode = #tpu.pipeline_mode<synchronous>, transform_indices = @transform_2, window_bounds = array<i64: 1, 128>}, {transform_indices = @transform_3, window_bounds = array<i64: 8, 128>}]} {
    %c0 = arith.constant 0 : index
    %c0_0 = arith.constant 0 : index
    %0 = vector.load %arg1[%c0, %c0_0] : memref<8x128xf32, #tpu.memory_space<vmem>>, vector<8x128xf32>
    %c0_1 = arith.constant 0 : index
    %c0_2 = arith.constant 0 : index
    %1 = vector.load %arg2[%c0_1, %c0_2] : memref<128x128xf32, #tpu.memory_space<vmem>>, vector<128x128xf32>
    %c0_3 = arith.constant 0 : index
    %c0_4 = arith.constant 0 : index
    %2 = vector.load %arg3[%c0_3, %c0_4] : memref<1x128xf32, #tpu.memory_space<vmem>>, vector<1x128xf32>
    %cst = arith.constant dense<0.000000e+00> : vector<8x128xf32>
    %3 = tpu.matmul %0, %1, %cst {dimension_numbers = #tpu.dot_dimension_numbers<[1], [0], [0], [1], [0, 0, 1, 1], [], []>} : vector<8x128xf32>, vector<128x128xf32>, vector<8x128xf32> -> vector<8x128xf32>
    %4 = vector.broadcast %2 : vector<1x128xf32> to vector<8x128xf32>
    %5 = arith.addf %3, %4 : vector<8x128xf32>
    %cst_5 = arith.constant 0.000000e+00 : f32
    %6 = vector.broadcast %cst_5 : f32 to vector<8x128xf32>
    %7 = arith.maximumf %5, %6 : vector<8x128xf32>
    %cst_6 = arith.constant dense<0.000000e+00> : vector<8x128xf32>
    %8 = tpu.matmul %7, %1, %cst_6 {dimension_numbers = #tpu.dot_dimension_numbers<[1], [0], [0], [1], [0, 0, 1, 1], [], []>} : vector<8x128xf32>, vector<128x128xf32>, vector<8x128xf32> -> vector<8x128xf32>
    %9 = vector.broadcast %2 : vector<1x128xf32> to vector<8x128xf32>
    %10 = arith.addf %8, %9 : vector<8x128xf32>
    %11 = arith.addf %0, %10 : vector<8x128xf32>
    %cst_7 = arith.constant 0.000000e+00 : f32
    %12 = vector.broadcast %cst_7 : f32 to vector<8x128xf32>
    %13 = arith.maximumf %11, %12 : vector<8x128xf32>
    %c0_8 = arith.constant 0 : index
    %c0_9 = arith.constant 0 : index
    %14 = vector.load %arg4[%c0_8, %c0_9] : memref<8x128xf32, #tpu.memory_space<vmem>>, vector<8x128xf32>
    tpu.vector_store %arg4[%c0_8, %c0_9], %13 {strides = array<i32>} : memref<8x128xf32, #tpu.memory_space<vmem>>, vector<8x128xf32>,
    return
  }
  func.func @transform_0(%arg0: i32) -> (i32, i32) {
    %c0_i32 = arith.constant 0 : i32
    %c0_i32_0 = arith.constant 0 : i32
    return %arg0, %c0_i32 : i32, i32
  }
  func.func @transform_1(%arg0: i32) -> (i32, i32) {
    %c0_i32 = arith.constant 0 : i32
    %c0_i32_0 = arith.constant 0 : i32
    %c0_i32_1 = arith.constant 0 : i32
    return %c0_i32, %c0_i32_0 : i32, i32
  }
  func.func @transform_2(%arg0: i32) -> (i32, i32) {
    %c0_i32 = arith.constant 0 : i32
    %c0_i32_0 = arith.constant 0 : i32
    %c0_i32_1 = arith.constant 0 : i32
    return %c0_i32, %c0_i32_0 : i32, i32
  }
  func.func @transform_3(%arg0: i32) -> (i32, i32) {
    %c0_i32 = arith.constant 0 : i32
    %c0_i32_0 = arith.constant 0 : i32
    return %arg0, %c0_i32 : i32, i32
  }
}

module attributes {stable_mosaic.version = 11 : i64} {
  func.func @residual_block_kernel(%arg0: i32, %arg1: memref<8x128xf32, #tpu.memory_space<vmem>>, %arg2: memref<128x128xf32, #tpu.memory_space<vmem>>, %arg3: memref<1x128xf32, #tpu.memory_space<vmem>>, %arg4: memref<8x128xf32, #tpu.memory_space<vmem>>) attributes {dimension_semantics = [#tpu.dimension_semantics<parallel>], iteration_bounds = array<i64: 1>, scalar_prefetch = 0 : i64, scratch_operands = 0 : i64, tpu.core_type = #tpu.core_type<tc>, window_params = [{transform_indices = @transform_0, window_bounds = array<i64: 8, 128>}, {pipeline_mode = #tpu.pipeline_mode<synchronous>, transform_indices = @transform_1, window_bounds = array<i64: 128, 128>}, {pipeline_mode = #tpu.pipeline_mode<synchronous>, transform_indices = @transform_2, window_bounds = array<i64: 1, 128>}, {transform_indices = @transform_3, window_bounds = array<i64: 8, 128>}]} {
    %c0 = arith.constant 0 : index
    %c0_0 = arith.constant 0 : index
    %0 = vector.load %arg1[%c0, %c0_0] : memref<8x128xf32, #tpu.memory_space<vmem>>, vector<8x128xf32>
    %c0_1 = arith.constant 0 : index
    %c0_2 = arith.constant 0 : index
    %1 = vector.load %arg2[%c0_1, %c0_2] : memref<128x128xf32, #tpu.memory_space<vmem>>, vector<128x128xf32>
    %c0_3 = arith.constant 0 : index
    %c0_4 = arith.constant 0 : index
    %2 = vector.load %arg3[%c0_3, %c0_4] : memref<1x128xf32, #tpu.memory_space<vmem>>, vector<1x128xf32>
    %cst = arith.constant dense<0.000000e+00> : vector<8x128xf32>
    %3 = tpu.matmul %0, %1, %cst {dimension_numbers = #tpu.dot_dimension_numbers<[1], [0], [0], [1], [0, 0, 1, 1], [], []>} : vector<8x128xf32>, vector<128x128xf32>, vector<8x128xf32> -> vector<8x128xf32>
    %4 = vector.broadcast %2 : vector<1x128xf32> to vector<8x128xf32>
    %5 = arith.addf %3, %4 : vector<8x128xf32>
    %cst_5 = arith.constant 0.000000e+00 : f32
    %6 = vector.broadcast %cst_5 : f32 to vector<8x128xf32>
    %7 = arith.maximumf %5, %6 : vector<8x128xf32>
    %cst_6 = arith.constant dense<0.000000e+00> : vector<8x128xf32>
    %8 = tpu.matmul %7, %1, %cst_6 {dimension_numbers = #tpu.dot_dimension_numbers<[1], [0], [0], [1], [0, 0, 1, 1], [], []>} : vector<8x128xf32>, vector<128x128xf32>, vector<8x128xf32> -> vector<8x128xf32>
    %9 = vector.broadcast %2 : vector<1x128xf32> to vector<8x128xf32>
    %10 = arith.addf %8, %9 : vector<8x128xf32>
    %11 = arith.addf %0, %10 : vector<8x128xf32>
    %cst_7 = arith.constant 0.000000e+00 : f32
    %12 = vector.broadcast %cst_7 : f32 to vector<8x128xf32>
    %13 = arith.maximumf %11, %12 : vector<8x128xf32>
    %c0_8 = arith.constant 0 : index
    %c0_9 = arith.constant 0 : index
    %14 = vector.load %arg4[%c0_8, %c0_9] : memref<8x128xf32, #tpu.memory_space<vmem>>, vector<8x128xf32>
    tpu.vector_store %arg4[%c0_8, %c0_9], %13 {strides = array<i32>} : memref<8x128xf32, #tpu.memory_space<vmem>>, vector<8x128xf32>,
    return
  }
  func.func @transform_0(%arg0: i32) -> (i32, i32) {
    %c0_i32 = arith.constant 0 : i32
    %c0_i32_0 = arith.constant 0 : i32
    return %arg0, %c0_i32 : i32, i32
  }
  func.func @transform_1(%arg0: i32) -> (i32, i32) {
    %c0_i32 = arith.constant 0 : i32
    %c0_i32_0 = arith.constant 0 : i32
    %c0_i32_1 = arith.constant 0 : i32
    return %c0_i32, %c0_i32_0 : i32, i32
  }
  func.func @transform_2(%arg0: i32) -> (i32, i32) {
    %c0_i32 = arith.constant 0 : i32
    %c0_i32_0 = arith.constant 0 : i32
    %c0_i32_1 = arith.constant 0 : i32
    return %c0_i32, %c0_i32_0 : i32, i32
  }
  func.func @transform_3(%arg0: i32) -> (i32, i32) {
    %c0_i32 = arith.constant 0 : i32
    %c0_i32_0 = arith.constant 0 : i32
    return %arg0, %c0_i32 : i32, i32
  }
}

</mosaic_0001>

<bundles_post_ra>
// kernel: tpu_custom_call.1
= control target key start
LH: loop header
LB: loop body
LE: loop exit
PB: predicated region body
PF: predicated region fallthrough
CT: control target
= control target key end

     0   :  { %8 = vsyncpa [#allocation3], 0  ;;  %s532_s0 = inlined_call_operand.hbm [shape: f32[8,128], index: 0, kind: input, shape index: {}]   ;;  %s533_s1 = inlined_call_operand.hbm [shape: f32[128,128], index: 1, kind: input, shape index: {}]   ;;  %s534_s2 = inlined_call_operand.vmem [shape: f32[1,128], index: 2, kind: input, shape index: {}]   ;;  %s535_s3 = inlined_call_operand.hbm [shape: f32[8,128], index: 3, kind: output, shape index: {}]  }
   0x1   :  { %9 = vsyncpa [#allocation6], 0 }
   0x2   :  { %10 = vsyncpa [#allocation4], 0  ;;  %s458_s12 = smov [#allocation2]   ;;  %s459_s14 = smov [#allocation5]  }
   0x3   :  { %s17_s13 = sshll.u32 %s458_s12, 4  ;;  %s26_s15 = sshll.u32 %s459_s14, 4  ;;  %s18_s13 = int_to_ptr.vmem [resolvable:$true] %s17_s13  ;;  %s486_s15 = int_to_ptr.vmem [resolvable:$true] %s26_s15 }
   0x4   :  { %s386_s18 = scalar_lea.hbm %s532_s0, 128 }
   0x5   :  { %p387_p0 = scmp.ne.s32.totalorder %s532_s0, %s386_s18  ;;  %p390_p1 = scmp.lt.u32.totalorder %s386_s18, %s532_s0 }
   0x7   :  { %p392_p2 = pnand %p390_p1, %p387_p0 }
   0x9   :  { %395 = shalt.err (!%p392_p2)
}
   0xa   :  { %s396_s23 = scalar_lea.vmem %s18_s13, 128  ;;  %p401_p4 = scmp.lt.s32.totalorder %s18_s13, %s18_s13 }
   0xb   :  { %p397_p3 = scmp.ne.s32.totalorder %s18_s13, %s396_s23  ;;  %p402_p5 = scmp.lt.s32.totalorder %s396_s23, %s396_s23 }
   0xd   :  { %p403_p6 = por %p402_p5, %p401_p4 }
   0xf   :  { %p404_p7 = pnand %p403_p6, %p397_p3 }
  0x11   :  { %407 = shalt.err (!%p404_p7)
}
  0x12   :  { %20 = dma.hbm_to_vmem [thread:$0]  %s532_s0, 128, %s18_s13, [#allocation3]  }
  0x13   :  { %s408_s28 = scalar_lea.hbm %s533_s1, 2048 }
  0x14   :  { %p409_p8 = scmp.ne.s32.totalorder %s533_s1, %s408_s28  ;;  %p412_p9 = scmp.lt.u32.totalorder %s408_s28, %s533_s1 }
  0x16   :  { %p414_p10 = pnand %p412_p9, %p409_p8 }
  0x18   :  { %417 = shalt.err (!%p414_p10)
}
  0x19   :  { %s418_s6 = scalar_lea.vmem %s486_s15, 2048  ;;  %p423_p12 = scmp.lt.s32.totalorder %s486_s15, %s486_s15 }
  0x1a   :  { %p419_p11 = scmp.ne.s32.totalorder %s486_s15, %s418_s6  ;;  %p424_p13 = scmp.lt.s32.totalorder %s418_s6, %s418_s6 }
  0x1c   :  { %p425_p0 = por %p424_p13, %p423_p12 }
  0x1e   :  { %p426_p1 = pnand %p425_p0, %p419_p11 }
  0x20   :  { %429 = shalt.err (!%p426_p1)
}
  0x21   :  { %s460_s0 = smov 128   ;;  %s461_s7 = smov 8  }
  0x22   :  { %32 = dma.hbm_to_vmem [thread:$0]  %s533_s1, 2048, %s486_s15, [#allocation6], %s460_s0, %s460_s0, %s461_s7  }
  0x23   :  { %452 = dma.done.wait [#allocation3], 128  }
  0x24   :  { %453 = vsyncadd [#allocation3], 4294967168 }
  0x25   :  { %454 = dma.done.wait [#allocation6], 2048  }
  0x26   :  { %455 = vsyncadd [#allocation6], 4294965248  ;;  %v462_v0 = vmov 0.0|0.0   ;;  %vm463_vm0 = vmmov 0   ;;  %v464_v1 = vmov 0.0   ;;  %v42_v2 = vld [vmem:[#allocation5] sm:$0xff] }
  0x27   :  { %330 = vmatprep.subr.bf16.mxu0 %v462_v0  ;;  %292 = vmatprep.mubr.msk.f32.mxu0 %vm463_vm0, %v464_v1  ;;  %v43_v3 = vld [vmem:[#allocation5 + $0x8] sm:$0xff]  ;;  %v44_v4 = vld [vmem:[#allocation5 + $0x10] sm:$0xff]  ;;  %v45_v6 = vld [vmem:[#allocation5 + $0x18] sm:$0xff]  ;;  %s465_s11 = smov [#allocation7]  }
  0x28   :  { %354 = vmatprep.subr.bf16.mxu1 %v462_v0  ;;  %327 = vmatprep.mubr.msk.f32.mxu1 %vm463_vm0, %v464_v1  ;;  %v331_v5 = vpack.c.bf16 %v43_v3, %v42_v2  ;;  %v334_v7 = vpack.c.bf16 %v45_v6, %v44_v4  ;;  %v46_v8 = vld [vmem:[#allocation5 + $0x20] sm:$0xff]  ;;  %v47_v9 = vld [vmem:[#allocation5 + $0x28] sm:$0xff]  ;;  %v48_v11 = vld [vmem:[#allocation5 + $0x30] sm:$0xff]  ;;  %s215_s12 = sshll.u32 %s465_s11, 4  ;;  %s216_s12 = int_to_ptr.vmem [resolvable:$true] %s215_s12 }
  0x29   :  { %v337_v10 = vpack.c.bf16 %v47_v9, %v46_v8  ;;  %v49_v12 = vld [vmem:[#allocation5 + $0x38] sm:$0xff]  ;;  %v50_v14 = vld [vmem:[#allocation5 + $0x40] sm:$0xff]  ;;  %v51_v15 = vld [vmem:[#allocation5 + $0x48] sm:$0xff]  ;;  %s430_s13 = scalar_lea.vmem %s216_s12, 128  ;;  %p435_p3 = scmp.lt.s32.totalorder %s216_s12, %s216_s12 }
  0x2a   :  { %332 = vmatpush3.bf16.msra.mxu0 %v331_v5  ;;  %356 = vmatpush3.bf16.msra.mxu1 %v331_v5  ;;  %v340_v13 = vpack.c.bf16 %v49_v12, %v48_v11  ;;  %v343_v16 = vpack.c.bf16 %v51_v15, %v50_v14  ;;  %v52_v17 = vld [vmem:[#allocation5 + $0x50] sm:$0xff]  ;;  %v53_v18 = vld [vmem:[#allocation5 + $0x58] sm:$0xff]  ;;  %v54_v20 = vld [vmem:[#allocation5 + $0x60] sm:$0xff]  ;;  %p431_p2 = scmp.ne.s32.totalorder %s216_s12, %s430_s13  ;;  %p436_p4 = scmp.lt.s32.totalorder %s430_s13, %s430_s13 }
  0x2b   :  { %333 = vmatprep.subr.bf16.mxu0 %v462_v0  ;;  %357 = vmatprep.subr.bf16.mxu1 %v462_v0  ;;  %v346_v19 = vpack.c.bf16 %v53_v18, %v52_v17  ;;  %v55_v21 = vld [vmem:[#allocation5 + $0x68] sm:$0xff]  ;;  %v56_v23 = vld [vmem:[#allocation5 + $0x70] sm:$0xff]  ;;  %v57_v24 = vld [vmem:[#allocation5 + $0x78] sm:$0xff] }
  0x2c   :  { %v349_v22 = vpack.c.bf16 %v55_v21, %v54_v20  ;;  %v352_v25 = vpack.c.bf16 %v57_v24, %v56_v23  ;;  %v41_v26 = vld [vmem:[#allocation2] sm:$0xff]  ;;  %p437_p5 = por %p436_p4, %p435_p3 }
  0x2d   :  { %v225_v27 = vld [vmem:[%s534_s2] ss:$0 sm:$0xff] }
  0x2e   :  { %335 = vmatpush3.bf16.msra.mxu0 %v334_v7  ;;  %359 = vmatpush3.bf16.msra.mxu1 %v334_v7  ;;  %p438_p6 = pnand %p437_p5, %p431_p2 }
  0x2f   :  { %336 = vmatprep.subr.bf16.mxu0 %v462_v0  ;;  %360 = vmatprep.subr.bf16.mxu1 %v462_v0 }
  0x32   :  { %338 = vmatpush3.bf16.msra.mxu0 %v337_v10  ;;  %362 = vmatpush3.bf16.msra.mxu1 %v337_v10 }
  0x33   :  { %339 = vmatprep.subr.bf16.mxu0 %v462_v0  ;;  %363 = vmatprep.subr.bf16.mxu1 %v462_v0 }
  0x36   :  { %341 = vmatpush3.bf16.msra.mxu0 %v340_v13  ;;  %365 = vmatpush3.bf16.msra.mxu1 %v340_v13 }
  0x37   :  { %342 = vmatprep.subr.bf16.mxu0 %v462_v0  ;;  %366 = vmatprep.subr.bf16.mxu1 %v462_v0 }
  0x3a   :  { %344 = vmatpush3.bf16.msra.mxu0 %v343_v16  ;;  %368 = vmatpush3.bf16.msra.mxu1 %v343_v16 }
  0x3b   :  { %345 = vmatprep.subr.bf16.mxu0 %v462_v0  ;;  %369 = vmatprep.subr.bf16.mxu1 %v462_v0 }
  0x3e   :  { %347 = vmatpush3.bf16.msra.mxu0 %v346_v19  ;;  %371 = vmatpush3.bf16.msra.mxu1 %v346_v19 }
  0x3f   :  { %348 = vmatprep.subr.bf16.mxu0 %v462_v0  ;;  %372 = vmatprep.subr.bf16.mxu1 %v462_v0 }
  0x42   :  { %350 = vmatpush3.bf16.msra.mxu0 %v349_v22  ;;  %374 = vmatpush3.bf16.msra.mxu1 %v349_v22 }
  0x43   :  { %351 = vmatprep.subr.bf16.mxu0 %v462_v0  ;;  %375 = vmatprep.subr.bf16.mxu1 %v462_v0 }
  0x46   :  { %353 = vmatpush3.bf16.msra.mxu0 %v352_v25  ;;  %377 = vmatpush3.bf16.msra.mxu1 %v352_v25 }
  0x49   :  { %293 = vmatmul.mubr.f32.vlgmr.msra.gmra.mrb[0].mxu0 %v41_v26 }
 0x11c   :  { %v131_v28 = vpop.f32.mrb[0].mxu0 }
 0x11d   :  { %v132_v29 = vadd.f32 %v225_v27, %v131_v28  ;;  %v294_v30 = vpop.f32.mrb[1].mxu0 }
 0x11f   :  { %v135_v31 = vmax.f32 %v132_v29, 0.0 }
 0x121   :  { %328 = vmatmul.mubr.f32.vlgmr.msra.gmra.mrb[0].mxu1 %v135_v31 }
 0x1f4   :  { %v202_v32 = vpop.f32.mrb[0].mxu1 }
 0x1f5   :  { %v203_v33 = vadd.f32 %v225_v27, %v202_v32  ;;  %v329_v34 = vpop.f32.mrb[1].mxu1 }
 0x1f7   :  { %v206_v35 = vadd.f32 %v203_v33, %v41_v26 }
 0x1f9   :  { %v207_v36 = vmax.f32 %v206_v35, 0.0 }
 0x1fb   :  { %208 = vst [vmem:[#allocation7] sm:$0xff] %v207_v36 }
 0x1fc   :  { %441 = shalt.err (!%p438_p6)
}
 0x1fd   :  { %s442_s15 = scalar_lea.hbm %s535_s3, 128 }
 0x1fe   :  { %p443_p7 = scmp.ne.s32.totalorder %s535_s3, %s442_s15  ;;  %p446_p8 = scmp.lt.u32.totalorder %s442_s15, %s535_s3 }
 0x200   :  { %p448_p9 = pnand %p446_p8, %p443_p7 }
 0x202   :  { %451 = shalt.err (!%p448_p9)
}
 0x203   :  { %218 = dma.vmem_to_hbm [thread:$0]  %s216_s12, 128, %s535_s3, [#allocation4]  }
 0x204   :  { %456 = dma.done.wait [#allocation4], 128  }
 0x205   :  { %457 = vsyncadd [#allocation4], 4294967168 }
 0x206   :  { %222 = vsyncpa [#allocation3], 1 }
 0x207   :  { %223 = vsyncpa [#allocation6], 1 }
 0x208   :  { %224 = vsyncpa [#allocation4], 1 }

// kernel: tpu_custom_call.1
= control target key start
LH: loop header
LB: loop body
LE: loop exit
PB: predicated region body
PF: predicated region fallthrough
CT: control target
= control target key end

     0   :  { %8 = vsyncpa [#allocation3], 0  ;;  %s532_s0 = inlined_call_operand.hbm [shape: f32[8,128], index: 0, kind: input, shape index: {}]   ;;  %s533_s1 = inlined_call_operand.hbm [shape: f32[128,128], index: 1, kind: input, shape index: {}]   ;;  %s534_s2 = inlined_call_operand.vmem [shape: f32[1,128], index: 2, kind: input, shape index: {}]   ;;  %s535_s3 = inlined_call_operand.hbm [shape: f32[8,128], index: 3, kind: output, shape index: {}]  }
   0x1   :  { %9 = vsyncpa [#allocation6], 0 }
   0x2   :  { %10 = vsyncpa [#allocation4], 0  ;;  %s458_s12 = smov [#allocation2]   ;;  %s459_s14 = smov [#allocation5]  }
   0x3   :  { %s17_s13 = sshll.u32 %s458_s12, 4  ;;  %s26_s15 = sshll.u32 %s459_s14, 4  ;;  %s18_s13 = int_to_ptr.vmem [resolvable:$true] %s17_s13  ;;  %s486_s15 = int_to_ptr.vmem [resolvable:$true] %s26_s15 }
   0x4   :  { %s386_s18 = scalar_lea.hbm %s532_s0, 128 }
   0x5   :  { %p387_p0 = scmp.ne.s32.totalorder %s532_s0, %s386_s18  ;;  %p390_p1 = scmp.lt.u32.totalorder %s386_s18, %s532_s0 }
   0x7   :  { %p392_p2 = pnand %p390_p1, %p387_p0 }
   0x9   :  { %395 = shalt.err (!%p392_p2)
}
   0xa   :  { %s396_s23 = scalar_lea.vmem %s18_s13, 128  ;;  %p401_p4 = scmp.lt.s32.totalorder %s18_s13, %s18_s13 }
   0xb   :  { %p397_p3 = scmp.ne.s32.totalorder %s18_s13, %s396_s23  ;;  %p402_p5 = scmp.lt.s32.totalorder %s396_s23, %s396_s23 }
   0xd   :  { %p403_p6 = por %p402_p5, %p401_p4 }
   0xf   :  { %p404_p7 = pnand %p403_p6, %p397_p3 }
  0x11   :  { %407 = shalt.err (!%p404_p7)
}
  0x12   :  { %20 = dma.hbm_to_vmem [thread:$0]  %s532_s0, 128, %s18_s13, [#allocation3]  }
  0x13   :  { %s408_s28 = scalar_lea.hbm %s533_s1, 2048 }
  0x14   :  { %p409_p8 = scmp.ne.s32.totalorder %s533_s1, %s408_s28  ;;  %p412_p9 = scmp.lt.u32.totalorder %s408_s28, %s533_s1 }
  0x16   :  { %p414_p10 = pnand %p412_p9, %p409_p8 }
  0x18   :  { %417 = shalt.err (!%p414_p10)
}
  0x19   :  { %s418_s6 = scalar_lea.vmem %s486_s15, 2048  ;;  %p423_p12 = scmp.lt.s32.totalorder %s486_s15, %s486_s15 }
  0x1a   :  { %p419_p11 = scmp.ne.s32.totalorder %s486_s15, %s418_s6  ;;  %p424_p13 = scmp.lt.s32.totalorder %s418_s6, %s418_s6 }
  0x1c   :  { %p425_p0 = por %p424_p13, %p423_p12 }
  0x1e   :  { %p426_p1 = pnand %p425_p0, %p419_p11 }
  0x20   :  { %429 = shalt.err (!%p426_p1)
}
  0x21   :  { %s460_s0 = smov 128   ;;  %s461_s7 = smov 8  }
  0x22   :  { %32 = dma.hbm_to_vmem [thread:$0]  %s533_s1, 2048, %s486_s15, [#allocation6], %s460_s0, %s460_s0, %s461_s7  }
  0x23   :  { %452 = dma.done.wait [#allocation3], 128  }
  0x24   :  { %453 = vsyncadd [#allocation3], 4294967168 }
  0x25   :  { %454 = dma.done.wait [#allocation6], 2048  }
  0x26   :  { %455 = vsyncadd [#allocation6], 4294965248  ;;  %v462_v0 = vmov 0.0|0.0   ;;  %vm463_vm0 = vmmov 0   ;;  %v464_v1 = vmov 0.0   ;;  %v42_v2 = vld [vmem:[#allocation5] sm:$0xff] }
  0x27   :  { %330 = vmatprep.subr.bf16.mxu0 %v462_v0  ;;  %292 = vmatprep.mubr.msk.f32.mxu0 %vm463_vm0, %v464_v1  ;;  %v43_v3 = vld [vmem:[#allocation5 + $0x8] sm:$0xff]  ;;  %v44_v4 = vld [vmem:[#allocation5 + $0x10] sm:$0xff]  ;;  %v45_v6 = vld [vmem:[#allocation5 + $0x18] sm:$0xff]  ;;  %s465_s11 = smov [#allocation7]  }
  0x28   :  { %354 = vmatprep.subr.bf16.mxu1 %v462_v0  ;;  %327 = vmatprep.mubr.msk.f32.mxu1 %vm463_vm0, %v464_v1  ;;  %v331_v5 = vpack.c.bf16 %v43_v3, %v42_v2  ;;  %v334_v7 = vpack.c.bf16 %v45_v6, %v44_v4  ;;  %v46_v8 = vld [vmem:[#allocation5 + $0x20] sm:$0xff]  ;;  %v47_v9 = vld [vmem:[#allocation5 + $0x28] sm:$0xff]  ;;  %v48_v11 = vld [vmem:[#allocation5 + $0x30] sm:$0xff]  ;;  %s215_s12 = sshll.u32 %s465_s11, 4  ;;  %s216_s12 = int_to_ptr.vmem [resolvable:$true] %s215_s12 }
  0x29   :  { %v337_v10 = vpack.c.bf16 %v47_v9, %v46_v8  ;;  %v49_v12 = vld [vmem:[#allocation5 + $0x38] sm:$0xff]  ;;  %v50_v14 = vld [vmem:[#allocation5 + $0x40] sm:$0xff]  ;;  %v51_v15 = vld [vmem:[#allocation5 + $0x48] sm:$0xff]  ;;  %s430_s13 = scalar_lea.vmem %s216_s12, 128  ;;  %p435_p3 = scmp.lt.s32.totalorder %s216_s12, %s216_s12 }
  0x2a   :  { %332 = vmatpush3.bf16.msra.mxu0 %v331_v5  ;;  %356 = vmatpush3.bf16.msra.mxu1 %v331_v5  ;;  %v340_v13 = vpack.c.bf16 %v49_v12, %v48_v11  ;;  %v343_v16 = vpack.c.bf16 %v51_v15, %v50_v14  ;;  %v52_v17 = vld [vmem:[#allocation5 + $0x50] sm:$0xff]  ;;  %v53_v18 = vld [vmem:[#allocation5 + $0x58] sm:$0xff]  ;;  %v54_v20 = vld [vmem:[#allocation5 + $0x60] sm:$0xff]  ;;  %p431_p2 = scmp.ne.s32.totalorder %s216_s12, %s430_s13  ;;  %p436_p4 = scmp.lt.s32.totalorder %s430_s13, %s430_s13 }
  0x2b   :  { %333 = vmatprep.subr.bf16.mxu0 %v462_v0  ;;  %357 = vmatprep.subr.bf16.mxu1 %v462_v0  ;;  %v346_v19 = vpack.c.bf16 %v53_v18, %v52_v17  ;;  %v55_v21 = vld [vmem:[#allocation5 + $0x68] sm:$0xff]  ;;  %v56_v23 = vld [vmem:[#allocation5 + $0x70] sm:$0xff]  ;;  %v57_v24 = vld [vmem:[#allocation5 + $0x78] sm:$0xff] }
  0x2c   :  { %v349_v22 = vpack.c.bf16 %v55_v21, %v54_v20  ;;  %v352_v25 = vpack.c.bf16 %v57_v24, %v56_v23  ;;  %v41_v26 = vld [vmem:[#allocation2] sm:$0xff]  ;;  %p437_p5 = por %p436_p4, %p435_p3 }
  0x2d   :  { %v225_v27 = vld [vmem:[%s534_s2] ss:$0 sm:$0xff] }
  0x2e   :  { %335 = vmatpush3.bf16.msra.mxu0 %v334_v7  ;;  %359 = vmatpush3.bf16.msra.mxu1 %v334_v7  ;;  %p438_p6 = pnand %p437_p5, %p431_p2 }
  0x2f   :  { %336 = vmatprep.subr.bf16.mxu0 %v462_v0  ;;  %360 = vmatprep.subr.bf16.mxu1 %v462_v0 }
  0x32   :  { %338 = vmatpush3.bf16.msra.mxu0 %v337_v10  ;;  %362 = vmatpush3.bf16.msra.mxu1 %v337_v10 }
  0x33   :  { %339 = vmatprep.subr.bf16.mxu0 %v462_v0  ;;  %363 = vmatprep.subr.bf16.mxu1 %v462_v0 }
  0x36   :  { %341 = vmatpush3.bf16.msra.mxu0 %v340_v13  ;;  %365 = vmatpush3.bf16.msra.mxu1 %v340_v13 }
  0x37   :  { %342 = vmatprep.subr.bf16.mxu0 %v462_v0  ;;  %366 = vmatprep.subr.bf16.mxu1 %v462_v0 }
  0x3a   :  { %344 = vmatpush3.bf16.msra.mxu0 %v343_v16  ;;  %368 = vmatpush3.bf16.msra.mxu1 %v343_v16 }
  0x3b   :  { %345 = vmatprep.subr.bf16.mxu0 %v462_v0  ;;  %369 = vmatprep.subr.bf16.mxu1 %v462_v0 }
  0x3e   :  { %347 = vmatpush3.bf16.msra.mxu0 %v346_v19  ;;  %371 = vmatpush3.bf16.msra.mxu1 %v346_v19 }
  0x3f   :  { %348 = vmatprep.subr.bf16.mxu0 %v462_v0  ;;  %372 = vmatprep.subr.bf16.mxu1 %v462_v0 }
  0x42   :  { %350 = vmatpush3.bf16.msra.mxu0 %v349_v22  ;;  %374 = vmatpush3.bf16.msra.mxu1 %v349_v22 }
  0x43   :  { %351 = vmatprep.subr.bf16.mxu0 %v462_v0  ;;  %375 = vmatprep.subr.bf16.mxu1 %v462_v0 }
  0x46   :  { %353 = vmatpush3.bf16.msra.mxu0 %v352_v25  ;;  %377 = vmatpush3.bf16.msra.mxu1 %v352_v25 }
  0x49   :  { %293 = vmatmul.mubr.f32.vlgmr.msra.gmra.mrb[0].mxu0 %v41_v26 }
 0x11c   :  { %v131_v28 = vpop.f32.mrb[0].mxu0 }
 0x11d   :  { %v132_v29 = vadd.f32 %v225_v27, %v131_v28  ;;  %v294_v30 = vpop.f32.mrb[1].mxu0 }
 0x11f   :  { %v135_v31 = vmax.f32 %v132_v29, 0.0 }
 0x121   :  { %328 = vmatmul.mubr.f32.vlgmr.msra.gmra.mrb[0].mxu1 %v135_v31 }
 0x1f4   :  { %v202_v32 = vpop.f32.mrb[0].mxu1 }
 0x1f5   :  { %v203_v33 = vadd.f32 %v225_v27, %v202_v32  ;;  %v329_v34 = vpop.f32.mrb[1].mxu1 }
 0x1f7   :  { %v206_v35 = vadd.f32 %v203_v33, %v41_v26 }
 0x1f9   :  { %v207_v36 = vmax.f32 %v206_v35, 0.0 }
 0x1fb   :  { %208 = vst [vmem:[#allocation7] sm:$0xff] %v207_v36 }
 0x1fc   :  { %441 = shalt.err (!%p438_p6)
}
 0x1fd   :  { %s442_s15 = scalar_lea.hbm %s535_s3, 128 }
 0x1fe   :  { %p443_p7 = scmp.ne.s32.totalorder %s535_s3, %s442_s15  ;;  %p446_p8 = scmp.lt.u32.totalorder %s442_s15, %s535_s3 }
 0x200   :  { %p448_p9 = pnand %p446_p8, %p443_p7 }
 0x202   :  { %451 = shalt.err (!%p448_p9)
}
 0x203   :  { %218 = dma.vmem_to_hbm [thread:$0]  %s216_s12, 128, %s535_s3, [#allocation4]  }
 0x204   :  { %456 = dma.done.wait [#allocation4], 128  }
 0x205   :  { %457 = vsyncadd [#allocation4], 4294967168 }
 0x206   :  { %222 = vsyncpa [#allocation3], 1 }
 0x207   :  { %223 = vsyncpa [#allocation6], 1 }
 0x208   :  { %224 = vsyncpa [#allocation4], 1 }

</bundles_post_ra>
